<compile_context>
chip_gen: v6e
topology: v6e:2x2x1
jax: 0.10.0
libtpu: 0.0.40
codegen_flags: <defaults>
</compile_context>

<pallas_src>
import jax
import jax.numpy as jnp
from jax.experimental import pallas as pl
from jax.experimental.pallas import tpu as pltpu

# ----------------------------- configuration -------------------------------
HID_FEATS = 64
OUT_FEATS = 64                       # forward only type-checks if out == hid
IM_SIZE = HID_FEATS + OUT_FEATS      # 128
BACKBONE_DIM = 768
N_HEADS = 8
D_V = 16
BATCH = 32
NEG_SLOPE = 0.01                     # torch.nn.LeakyReLU default


# ------------------------------- kernel ------------------------------------
def visfeat_kernel(x_ref, w_head_ref, w_pack_ref, w_l2_ref, b_ref, out_ref):
    nb = out_ref.shape[0]

    def leaky(v):
        return jnp.where(v > 0, v, NEG_SLOPE * v)

    # Head matmul: x_ref is (2B, 768) = [img rows ; noise rows], w_head is
    # (768, 128) = [W_head_img | W_head_noise].  y[:B, :64] and y[B:, 64:] are
    # the wanted halves; a lane select stitches them into the (B, 128) head
    # activation (exactly cat(head_v(img), head_n(noise))).
    y = jnp.dot(x_ref[...], w_head_ref[...], preferred_element_type=jnp.float32)
    lane = jax.lax.broadcasted_iota(jnp.int32, (nb, IM_SIZE), 1)
    x = leaky(jnp.where(lane < HID_FEATS, y[:nb, :], y[nb:, :]) + b_ref[0:1, :])

    # Packed attention + linear1 matmul (exact fold, see fuse_params):
    #   p[:, :128]  = x @ W_vo                     (attention path)
    #   p[:, 128:]  = x @ (W_l1 + W_vo @ W_l1)     == x2 @ W_l1
    p = jnp.dot(x.astype(jnp.bfloat16), w_pack_ref[...],
                preferred_element_type=jnp.float32)
    x2 = x + p[:, :IM_SIZE]
    h = jnp.maximum(p[:, IM_SIZE:] + b_ref[1:2, :], 0.0)

    # linear2 + residual; VisFeat then applies LeakyReLU and squeeze(1).
    ffn = jnp.dot(h.astype(jnp.bfloat16), w_l2_ref[...],
                  preferred_element_type=jnp.float32) + b_ref[2:3, :]
    out_ref[...] = leaky(ffn + x2)


# ------------------------------- wrapper ------------------------------------
def visfeat_forward(x_packed_bf16, fused):
    (w_head, w_pack, w_l2, biases) = fused
    two_b, k = x_packed_bf16.shape
    assert k == BACKBONE_DIM and two_b % 2 == 0
    b = two_b // 2

    full = lambda shape: pl.BlockSpec(shape, lambda i: (0, 0))

    return pl.pallas_call(
        visfeat_kernel,
        out_shape=jax.ShapeDtypeStruct((b, IM_SIZE), jnp.float32),
        grid=(1,),                                    # whole batch: one grid step
        in_specs=[
            full((two_b, BACKBONE_DIM)),              # x_packed (bf16)
            full((BACKBONE_DIM, IM_SIZE)),            # packed head weight (bf16)
            full((IM_SIZE, 2 * IM_SIZE)),             # [W_vo | W_l1 + W_vo@W_l1] (bf16)
            full((IM_SIZE, IM_SIZE)),                 # linear2 weight (bf16)
            full((3, IM_SIZE)),                       # [b_head; b_l1; b_l2] (f32)
        ],
        out_specs=full((b, IM_SIZE)),
        compiler_params=pltpu.CompilerParams(
            dimension_semantics=("arbitrary",)),
    )(x_packed_bf16, w_head, w_pack, w_l2, biases)


# --------------------------- parameter creation ------------------------------
def xavier_normal(key, shape):
    fan_in, fan_out = shape
    std = (2.0 / (fan_in + fan_out)) ** 0.5
    return std * jax.random.normal(key, shape, dtype=jnp.float32)


def make_raw_params(key):
    """Parameters in the original (per-layer, pre-transposed (in,out)) layout."""
    ks = jax.random.split(key, 8)
    # head weights: torch.nn.init.eye_ on (hid, 768); stored transposed (768, hid)
    eye_w = jnp.eye(BACKBONE_DIM, HID_FEATS, dtype=jnp.float32)
    b_head_v = 0.01 * jax.random.normal(ks[0], (1, HID_FEATS), dtype=jnp.float32)
    b_head_n = 0.01 * jax.random.normal(ks[1], (1, HID_FEATS), dtype=jnp.float32)
    # TransformerBlock params (xavier normal, as in __init_weights__)
    w_v = xavier_normal(ks[2], (IM_SIZE, N_HEADS * D_V))
    w_o = xavier_normal(ks[3], (N_HEADS * D_V, IM_SIZE))
    w_l1 = xavier_normal(ks[4], (IM_SIZE, IM_SIZE))   # already (in, out)
    w_l2 = xavier_normal(ks[5], (IM_SIZE, IM_SIZE))
    b_l1 = 0.01 * jax.random.normal(ks[6], (1, IM_SIZE), dtype=jnp.float32)
    b_l2 = 0.01 * jax.random.normal(ks[7], (1, IM_SIZE), dtype=jnp.float32)
    return (eye_w, b_head_v, eye_w, b_head_n, w_v, w_o, w_l1, b_l1, w_l2, b_l2)


def fuse_params(raw):
    """Offline (wrapper-side) exact fusions + bf16 cast of matmul weights."""
    (w_hv, b_hv, w_hn, b_hn, w_v, w_o, w_l1, b_l1, w_l2, b_l2) = raw
    # Lane-packed head weight: columns 0:64 = img head, 64:128 = noise head.
    # No structural zeros (192 KiB instead of a 384 KiB block-diagonal).
    w_head = jnp.concatenate([w_hv, w_hn], axis=1)             # (768, 128)
    b_head = jnp.concatenate([b_hv, b_hn], axis=1)             # (1, 128)
    # seq_len==1 attention collapse (no W_v/W_o biases, no LayerNorm): W_vo = W_v @ W_o.
    w_vo = w_v @ w_o                                           # (128, 128) f32
    # Exact fold of the attention residual into linear1:
    #   x2 = x + x @ W_vo  =>  x2 @ W_l1 = x @ (W_l1 + W_vo @ W_l1)
    # Products computed in f32, cast to bf16 once.
    w_pack = jnp.concatenate([w_vo, w_l1 + w_vo @ w_l1], axis=1)   # (128, 256)
    biases = jnp.concatenate([b_head, b_l1, b_l2], axis=0)     # (3, 128) f32
    bf = lambda w: w.astype(jnp.bfloat16)
    return (bf(w_head), bf(w_pack), bf(w_l2), biases)


# ------------------------------ reference ------------------------------------
def visfeat_ref(x_packed_bf16, fused):
    """Pure-JAX reference mirroring the kernel's bf16 operand rounding."""
    (w_head, w_pack, w_l2, b) = fused
    nb = x_packed_bf16.shape[0] // 2
    f32 = lambda a: a.astype(jnp.float32)
    bf16 = lambda a: a.astype(jnp.bfloat16)
    leaky = lambda v: jnp.where(v > 0, v, NEG_SLOPE * v)
    y = f32(x_packed_bf16) @ f32(w_head)                        # (2B, 128)
    lane = jnp.arange(IM_SIZE)[None, :]
    x = leaky(jnp.where(lane < HID_FEATS, y[:nb], y[nb:]) + b[0:1, :])
    p = f32(bf16(x)) @ f32(w_pack)                              # (B, 256)
    x2 = x + p[:, :IM_SIZE]
    h = jnp.maximum(p[:, IM_SIZE:] + b[1:2, :], 0.0)
    ffn = f32(bf16(h)) @ f32(w_l2) + b[2:3, :]
    return leaky(ffn + x2)


# --------------------------------- main ---------------------------------------
if __name__ == "__main__":
    key = jax.random.PRNGKey(0)
    k_img, k_noise, k_params = jax.random.split(key, 3)

    # Pre-head Swin-T backbone features for img and img_noise (f32).
    x_img = jax.random.normal(k_img, (BATCH, BACKBONE_DIM), dtype=jnp.float32)
    x_noise = jax.random.normal(k_noise, (BATCH, BACKBONE_DIM), dtype=jnp.float32)

    raw_params = make_raw_params(k_params)
    fused_params = fuse_params(raw_params)

    # Stack the two feature batches along rows (wrapper-side, free) and cast the
    # matmul input to bf16: rows 0..B-1 = img, rows B..2B-1 = noise.
    x_packed = jnp.concatenate([x_img, x_noise], axis=0).astype(jnp.bfloat16)

    out = visfeat_forward(x_packed, fused_params)
    out = jax.block_until_ready(out)

    ref = visfeat_ref(x_packed, fused_params)
    assert out.shape == (BATCH, IM_SIZE)
    assert jnp.allclose(out, ref, atol=2e-2, rtol=2e-2), (
        float(jnp.max(jnp.abs(out - ref))))

    print("KERNEL_OK")
</pallas_src>

<mosaic_0001>
module attributes {stable_mosaic.version = 11 : i64} {
  func.func @visfeat_kernel(%arg0: i32, %arg1: memref<64x768xbf16, #tpu.memory_space<vmem>>, %arg2: memref<768x128xbf16, #tpu.memory_space<vmem>>, %arg3: memref<128x256xbf16, #tpu.memory_space<vmem>>, %arg4: memref<128x128xbf16, #tpu.memory_space<vmem>>, %arg5: memref<3x128xf32, #tpu.memory_space<vmem>>, %arg6: memref<32x128xf32, #tpu.memory_space<vmem>>) attributes {dimension_semantics = [#tpu.dimension_semantics<arbitrary>], iteration_bounds = array<i64: 1>, scalar_prefetch = 0 : i64, scratch_operands = 0 : i64, tpu.core_type = #tpu.core_type<tc>, window_params = [{pipeline_mode = #tpu.pipeline_mode<synchronous>, transform_indices = @transform_0, window_bounds = array<i64: 64, 768>}, {pipeline_mode = #tpu.pipeline_mode<synchronous>, transform_indices = @transform_1, window_bounds = array<i64: 768, 128>}, {pipeline_mode = #tpu.pipeline_mode<synchronous>, transform_indices = @transform_2, window_bounds = array<i64: 128, 256>}, {pipeline_mode = #tpu.pipeline_mode<synchronous>, transform_indices = @transform_3, window_bounds = array<i64: 128, 128>}, {pipeline_mode = #tpu.pipeline_mode<synchronous>, transform_indices = @transform_4, window_bounds = array<i64: 3, 128>}, {pipeline_mode = #tpu.pipeline_mode<synchronous>, transform_indices = @transform_5, window_bounds = array<i64: 32, 128>}]} {
    %c0 = arith.constant 0 : index
    %c0_0 = arith.constant 0 : index
    %0 = vector.load %arg1[%c0, %c0_0] : memref<64x768xbf16, #tpu.memory_space<vmem>>, vector<64x768xbf16>
    %c0_1 = arith.constant 0 : index
    %c0_2 = arith.constant 0 : index
    %1 = vector.load %arg2[%c0_1, %c0_2] : memref<768x128xbf16, #tpu.memory_space<vmem>>, vector<768x128xbf16>
    %cst = arith.constant dense<0.000000e+00> : vector<64x128xf32>
    %2 = tpu.matmul %0, %1, %cst {dimension_numbers = #tpu.dot_dimension_numbers<[1], [0], [0], [1], [0, 0, 1, 1], [], []>} : vector<64x768xbf16>, vector<768x128xbf16>, vector<64x128xf32> -> vector<64x128xf32>
    %3 = tpu.iota {dimensions = array<i32: 1>} : vector<32x128xi32>
    %c64_i32 = arith.constant 64 : i32
    %4 = vector.broadcast %c64_i32 : i32 to vector<32x128xi32>
    %5 = arith.cmpi slt, %3, %4 : vector<32x128xi32>
    %6 = vector.extract_strided_slice %2 {offsets = [0, 0], sizes = [32, 128], strides = [1, 1]} : vector<64x128xf32> to vector<32x128xf32>
    %7 = vector.extract_strided_slice %2 {offsets = [32, 0], sizes = [32, 128], strides = [1, 1]} : vector<64x128xf32> to vector<32x128xf32>
    %8 = arith.select %5, %6, %7 : vector<32x128xi1>, vector<32x128xf32>
    %c0_3 = arith.constant 0 : index
    %c0_4 = arith.constant 0 : index
    %9 = vector.load %arg5[%c0_3, %c0_4] : memref<3x128xf32, #tpu.memory_space<vmem>>, vector<1x128xf32>
    %10 = vector.broadcast %9 : vector<1x128xf32> to vector<32x128xf32>
    %11 = arith.addf %8, %10 : vector<32x128xf32>
    %cst_5 = arith.constant 0.000000e+00 : f32
    %12 = vector.broadcast %cst_5 : f32 to vector<32x128xf32>
    %13 = arith.cmpf ogt, %11, %12 : vector<32x128xf32>
    %cst_6 = arith.constant 0.00999999977 : f32
    %14 = vector.broadcast %cst_6 : f32 to vector<32x128xf32>
    %15 = arith.mulf %14, %11 : vector<32x128xf32>
    %16 = arith.select %13, %11, %15 : vector<32x128xi1>, vector<32x128xf32>
    %17 = arith.truncf %16 : vector<32x128xf32> to vector<32x128xbf16>
    %c0_7 = arith.constant 0 : index
    %c0_8 = arith.constant 0 : index
    %18 = vector.load %arg3[%c0_7, %c0_8] : memref<128x256xbf16, #tpu.memory_space<vmem>>, vector<128x256xbf16>
    %cst_9 = arith.constant dense<0.000000e+00> : vector<32x256xf32>
    %19 = tpu.matmul %17, %18, %cst_9 {dimension_numbers = #tpu.dot_dimension_numbers<[1], [0], [0], [1], [0, 0, 1, 1], [], []>} : vector<32x128xbf16>, vector<128x256xbf16>, vector<32x256xf32> -> vector<32x256xf32>
    %20 = vector.extract_strided_slice %19 {offsets = [0, 0], sizes = [32, 128], strides = [1, 1]} : vector<32x256xf32> to vector<32x128xf32>
    %21 = arith.addf %16, %20 : vector<32x128xf32>
    %22 = vector.extract_strided_slice %19 {offsets = [0, 128], sizes = [32, 128], strides = [1, 1]} : vector<32x256xf32> to vector<32x128xf32>
    %c1 = arith.constant 1 : index
    %c0_10 = arith.constant 0 : index
    %23 = vector.load %arg5[%c1, %c0_10] : memref<3x128xf32, #tpu.memory_space<vmem>>, vector<1x128xf32>
    %24 = vector.broadcast %23 : vector<1x128xf32> to vector<32x128xf32>
    %25 = arith.addf %22, %24 : vector<32x128xf32>
    %cst_11 = arith.constant 0.000000e+00 : f32
    %26 = vector.broadcast %cst_11 : f32 to vector<32x128xf32>
    %27 = arith.maximumf %25, %26 : vector<32x128xf32>
    %28 = arith.truncf %27 : vector<32x128xf32> to vector<32x128xbf16>
    %c0_12 = arith.constant 0 : index
    %c0_13 = arith.constant 0 : index
    %29 = vector.load %arg4[%c0_12, %c0_13] : memref<128x128xbf16, #tpu.memory_space<vmem>>, vector<128x128xbf16>
    %cst_14 = arith.constant dense<0.000000e+00> : vector<32x128xf32>
    %30 = tpu.matmul %28, %29, %cst_14 {dimension_numbers = #tpu.dot_dimension_numbers<[1], [0], [0], [1], [0, 0, 1, 1], [], []>} : vector<32x128xbf16>, vector<128x128xbf16>, vector<32x128xf32> -> vector<32x128xf32>
    %c2 = arith.constant 2 : index
    %c0_15 = arith.constant 0 : index
    %31 = vector.load %arg5[%c2, %c0_15] : memref<3x128xf32, #tpu.memory_space<vmem>>, vector<1x128xf32>
    %32 = vector.broadcast %31 : vector<1x128xf32> to vector<32x128xf32>
    %33 = arith.addf %30, %32 : vector<32x128xf32>
    %34 = arith.addf %33, %21 : vector<32x128xf32>
    %cst_16 = arith.constant 0.000000e+00 : f32
    %35 = vector.broadcast %cst_16 : f32 to vector<32x128xf32>
    %36 = arith.cmpf ogt, %34, %35 : vector<32x128xf32>
    %cst_17 = arith.constant 0.00999999977 : f32
    %37 = vector.broadcast %cst_17 : f32 to vector<32x128xf32>
    %38 = arith.mulf %37, %34 : vector<32x128xf32>
    %39 = arith.select %36, %34, %38 : vector<32x128xi1>, vector<32x128xf32>
    %c0_18 = arith.constant 0 : index
    %c0_19 = arith.constant 0 : index
    %40 = vector.load %arg6[%c0_18, %c0_19] : memref<32x128xf32, #tpu.memory_space<vmem>>, vector<32x128xf32>
    tpu.vector_store %arg6[%c0_18, %c0_19], %39 {strides = array<i32>} : memref<32x128xf32, #tpu.memory_space<vmem>>, vector<32x128xf32>,
    return
  }
  func.func @transform_0(%arg0: i32) -> (i32, i32) {
    %c0_i32 = arith.constant 0 : i32
    %c0_i32_0 = arith.constant 0 : i32
    %c0_i32_1 = arith.constant 0 : i32
    return %c0_i32, %c0_i32_0 : i32, i32
  }
  func.func @transform_1(%arg0: i32) -> (i32, i32) {
    %c0_i32 = arith.constant 0 : i32
    %c0_i32_0 = arith.constant 0 : i32
    %c0_i32_1 = arith.constant 0 : i32
    return %c0_i32, %c0_i32_0 : i32, i32
  }
  func.func @transform_2(%arg0: i32) -> (i32, i32) {
    %c0_i32 = arith.constant 0 : i32
    %c0_i32_0 = arith.constant 0 : i32
    %c0_i32_1 = arith.constant 0 : i32
    return %c0_i32, %c0_i32_0 : i32, i32
  }
  func.func @transform_3(%arg0: i32) -> (i32, i32) {
    %c0_i32 = arith.constant 0 : i32
    %c0_i32_0 = arith.constant 0 : i32
    %c0_i32_1 = arith.constant 0 : i32
    return %c0_i32, %c0_i32_0 : i32, i32
  }
  func.func @transform_4(%arg0: i32) -> (i32, i32) {
    %c0_i32 = arith.constant 0 : i32
    %c0_i32_0 = arith.constant 0 : i32
    %c0_i32_1 = arith.constant 0 : i32
    return %c0_i32, %c0_i32_0 : i32, i32
  }
  func.func @transform_5(%arg0: i32) -> (i32, i32) {
    %c0_i32 = arith.constant 0 : i32
    %c0_i32_0 = arith.constant 0 : i32
    %c0_i32_1 = arith.constant 0 : i32
    return %c0_i32, %c0_i32_0 : i32, i32
  }
}

</mosaic_0001>

<bundles_post_ra>
// kernel: tpu_custom_call.1
= control target key start
LH: loop header
LB: loop body
LE: loop exit
PB: predicated region body
PF: predicated region fallthrough
CT: control target
= control target key end

     0   :  { %10 = vsyncpa [#allocation3], 0  ;;  %s1741_s0 = inlined_call_operand.hbm [shape: bf16[64,768], index: 0, kind: input, shape index: {}]   ;;  %s1742_s1 = inlined_call_operand.hbm [shape: bf16[768,128], index: 1, kind: input, shape index: {}]   ;;  %s1743_s2 = inlined_call_operand.hbm [shape: bf16[128,256], index: 2, kind: input, shape index: {}]   ;;  %s1744_s3 = inlined_call_operand.hbm [shape: bf16[128,128], index: 3, kind: input, shape index: {}]   ;;  %s1745_s4 = inlined_call_operand.vmem [shape: f32[3,128], index: 4, kind: input, shape index: {}]   ;;  %s1746_s5 = inlined_call_operand.hbm [shape: f32[32,128], index: 5, kind: output, shape index: {}]  }
   0x1   :  { %11 = vsyncpa [#allocation6], 0 }
   0x2   :  { %12 = vsyncpa [#allocation9], 0 }
   0x3   :  { %13 = vsyncpa [#allocation4], 0  ;;  %s1640_s18 = smov [#allocation5]  }
   0x4   :  { %s31_s19 = sshll.u32 %s1640_s18, 4  ;;  %s32_s19 = int_to_ptr.vmem [resolvable:$true] %s31_s19 }
   0x5   :  { %s1540_s20 = scalar_lea.vmem %s32_s19, 6144  ;;  %p1545_p1 = scmp.lt.s32.totalorder %s32_s19, %s32_s19 }
   0x6   :  { %p1541_p0 = scmp.ne.s32.totalorder %s32_s19, %s1540_s20  ;;  %p1546_p2 = scmp.lt.s32.totalorder %s1540_s20, %s1540_s20 }
   0x8   :  { %p1547_p3 = por %p1546_p2, %p1545_p1 }
   0xa   :  { %p1548_p4 = pnand %p1547_p3, %p1541_p0 }
   0xc   :  { %1551 = shalt.err (!%p1548_p4)
}
   0xd   :  { %s1641_s21 = smov 64   ;;  %s1642_s22 = smov 4  }
   0xe   :  { %37 = dma.hbm_to_vmem [thread:$0]  %s1742_s1, 6144, %s32_s19, [#allocation6], %s1641_s21, %s1641_s21, %s1642_s22  }
   0xf   :  { %s1643_s25 = smov [#allocation2]  }
  0x10   :  { %s19_s26 = sshll.u32 %s1643_s25, 4  ;;  %s20_s26 = int_to_ptr.vmem [resolvable:$true] %s19_s26 }
  0x11   :  { %s1560_s27 = scalar_lea.vmem %s20_s26, 3072  ;;  %p1565_p6 = scmp.lt.s32.totalorder %s20_s26, %s20_s26 }
  0x12   :  { %p1561_p5 = scmp.ne.s32.totalorder %s20_s26, %s1560_s27  ;;  %p1566_p7 = scmp.lt.s32.totalorder %s1560_s27, %s1560_s27 }
  0x14   :  { %p1567_p8 = por %p1566_p7, %p1565_p6 }
  0x16   :  { %p1568_p9 = pnand %p1567_p8, %p1561_p5 }
  0x18   :  { %1571 = shalt.err (!%p1568_p9)
}
  0x19   :  { %s1644_s28 = smov 384   ;;  %s1645_s29 = smov 24  }
  0x1a   :  { %25 = dma.hbm_to_vmem [thread:$0]  %s1741_s0, 3072, %s20_s26, [#allocation3], %s1644_s28, %s1644_s28, %s1645_s29  }
  0x1b   :  { %s1646_s7 = smov [#allocation7]  }
  0x1c   :  { %s43_s8 = sshll.u32 %s1646_s7, 4  ;;  %s44_s8 = int_to_ptr.vmem [resolvable:$true] %s43_s8 }
  0x1d   :  { %s1580_s1 = scalar_lea.vmem %s44_s8, 2048  ;;  %p1585_p11 = scmp.lt.s32.totalorder %s44_s8, %s44_s8 }
  0x1e   :  { %p1581_p10 = scmp.ne.s32.totalorder %s44_s8, %s1580_s1  ;;  %p1586_p12 = scmp.lt.s32.totalorder %s1580_s1, %s1580_s1 }
  0x20   :  { %p1587_p13 = por %p1586_p12, %p1585_p11 }
  0x22   :  { %p1588_p0 = pnand %p1587_p13, %p1581_p10 }
  0x24   :  { %1591 = shalt.err (!%p1588_p0)
}
  0x25   :  { %s1647_s9 = smov 128   ;;  %s1648_s10 = smov 8  }
  0x26   :  { %49 = dma.hbm_to_vmem [thread:$0]  %s1743_s2, 2048, %s44_s8, [#allocation6], %s1647_s9, %s1647_s9, %s1648_s10  }
  0x27   :  { %s1649_s0 = smov [#allocation8]  }
  0x28   :  { %s55_s13 = sshll.u32 %s1649_s0, 4  ;;  %s56_s13 = int_to_ptr.vmem [resolvable:$true] %s55_s13 }
  0x29   :  { %s1600_s14 = scalar_lea.vmem %s56_s13, 1024  ;;  %p1605_p2 = scmp.lt.s32.totalorder %s56_s13, %s56_s13 }
  0x2a   :  { %p1601_p1 = scmp.ne.s32.totalorder %s56_s13, %s1600_s14  ;;  %p1606_p3 = scmp.lt.s32.totalorder %s1600_s14, %s1600_s14 }
  0x2c   :  { %p1607_p4 = por %p1606_p3, %p1605_p2 }
  0x2e   :  { %p1608_p5 = pnand %p1607_p4, %p1601_p1 }
  0x30   :  { %1611 = shalt.err (!%p1608_p5)
}
  0x31   :  { %61 = dma.hbm_to_vmem [thread:$0]  %s1744_s3, 1024, %s56_s13, [#allocation9], %s1641_s21, %s1641_s21, %s1642_s22  }
  0x32   :  { %1632 = dma.done.wait [#allocation3], 3072  }
  0x33   :  { %1633 = vsyncadd [#allocation3], 4294964224 }
  0x34   :  { %1634 = dma.done.wait [#allocation6], 8192  }
  0x35   :  { %1635 = vsyncadd [#allocation6], 4294959104 }
  0x36   :  { %1636 = dma.done.wait [#allocation9], 1024  }
  0x37   :  { %1637 = vsyncadd [#allocation9], 4294966272  ;;  %v1416_v0 = vld [vmem:[#allocation5 + $0x78] sm:$0xff]   ;;  %v1420_v4 = vld [vmem:[#allocation5 + $0x70] sm:$0xff]  }
  0x38   :  { %v1417_v1 = vld [vmem:[#allocation5 + $0xf8] sm:$0xff]   ;;  %1254 = vmatprep.subr.bf16.mxu0 %v1416_v0  ;;  %v1421_v5 = vld [vmem:[#allocation5 + $0xf0] sm:$0xff]   ;;  %v1424_v8 = vld [vmem:[#allocation5 + $0x68] sm:$0xff]  }
  0x39   :  { %v1418_v2 = vld [vmem:[#allocation5 + $0x38] sm:$0xff]   ;;  %1294 = vmatprep.subr.bf16.mxu1 %v1417_v1  ;;  %v1422_v6 = vld [vmem:[#allocation5 + $0x30] sm:$0xff]   ;;  %v1425_v9 = vld [vmem:[#allocation5 + $0xe8] sm:$0xff]  }
  0x3a   :  { %v1419_v3 = vld [vmem:[#allocation5 + $0xb8] sm:$0xff]   ;;  %1255 = vmatpush3.bf16.msra.mxu0 %v1418_v2  ;;  %v1423_v7 = vld [vmem:[#allocation5 + $0xb0] sm:$0xff]   ;;  %v1426_v10 = vld [vmem:[#allocation5 + $0x28] sm:$0xff]  }
  0x3b   :  { %1295 = vmatpush3.bf16.msra.mxu1 %v1419_v3  ;;  %1256 = vmatprep.subr.bf16.mxu0 %v1420_v4  ;;  %v1427_v11 = vld [vmem:[#allocation5 + $0xa8] sm:$0xff]   ;;  %v1428_v12 = vld [vmem:[#allocation5 + $0x60] sm:$0xff]   ;;  %v1432_v16 = vld [vmem:[#allocation5 + $0x58] sm:$0xff]  }
  0x3c   :  { %1296 = vmatprep.subr.bf16.mxu1 %v1421_v5  ;;  %v1429_v13 = vld [vmem:[#allocation5 + $0xe0] sm:$0xff]   ;;  %v1433_v17 = vld [vmem:[#allocation5 + $0xd8] sm:$0xff]   ;;  %v1436_v20 = vld [vmem:[#allocation5 + $0x50] sm:$0xff]  }
  0x3d   :  { %v1430_v14 = vld [vmem:[#allocation5 + $0x20] sm:$0xff]   ;;  %v1434_v18 = vld [vmem:[#allocation5 + $0x18] sm:$0xff]   ;;  %v1437_v21 = vld [vmem:[#allocation5 + $0xd0] sm:$0xff]  }
  0x3e   :  { %1257 = vmatpush3.bf16.msra.mxu0 %v1422_v6  ;;  %v1431_v15 = vld [vmem:[#allocation5 + $0xa0] sm:$0xff]   ;;  %v1435_v19 = vld [vmem:[#allocation5 + $0x98] sm:$0xff]   ;;  %v1438_v22 = vld [vmem:[#allocation5 + $0x10] sm:$0xff]  }
  0x3f   :  { %1297 = vmatpush3.bf16.msra.mxu1 %v1423_v7  ;;  %1258 = vmatprep.subr.bf16.mxu0 %v1424_v8  ;;  %v1439_v23 = vld [vmem:[#allocation5 + $0x90] sm:$0xff]   ;;  %v1440_v24 = vld [vmem:[#allocation5 + $0x48] sm:$0xff]   ;;  %v1444_v28 = vld [vmem:[#allocation5 + $0x40] sm:$0xff]  }
  0x40   :  { %1298 = vmatprep.subr.bf16.mxu1 %v1425_v9  ;;  %v1441_v25 = vld [vmem:[#allocation5 + $0xc8] sm:$0xff]   ;;  %v1445_v29 = vld [vmem:[#allocation5 + $0xc0] sm:$0xff]   ;;  %v1454_v36 = vld [vmem:[#allocation5 + $0x178] sm:$0xff]  }
  0x41   :  { %v1442_v26 = vld [vmem:[#allocation5 + $0x8] sm:$0xff]   ;;  %v1446_v30 = vld [vmem:[#allocation5] sm:$0xff]   ;;  %v1455_v37 = vld [vmem:[#allocation5 + $0x138] sm:$0xff]  }
  0x42   :  { %1259 = vmatpush3.bf16.msra.mxu0 %v1426_v10  ;;  %v1443_v27 = vld [vmem:[#allocation5 + $0x88] sm:$0xff]   ;;  %v1447_v31 = vld [vmem:[#allocation5 + $0x80] sm:$0xff]   ;;  %v1456_v38 = vld [vmem:[#allocation5 + $0x170] sm:$0xff]  }
  0x43   :  { %1299 = vmatpush3.bf16.msra.mxu1 %v1427_v11  ;;  %1260 = vmatprep.subr.bf16.mxu0 %v1428_v12  ;;  %v1448_v32 = vld [vmem:[#allocation2] ss:$24 sps:$4 sm:$0xff]   ;;  %v1450_v33 = vld [vmem:[#allocation2 + $0x4] ss:$24 sps:$4 sm:$0xff]   ;;  %v1457_v39 = vld [vmem:[#allocation5 + $0x130] sm:$0xff]  }
  0x44   :  { %1300 = vmatprep.subr.bf16.mxu1 %v1429_v13  ;;  %v1451_v34 = vld [vmem:[#allocation2 + $0x8] ss:$24 sps:$4 sm:$0xff]   ;;  %v1453_v35 = vld [vmem:[#allocation2 + $0xc] ss:$24 sps:$4 sm:$0xff]   ;;  %637 = vmatprep.mubr.bf16.mxu0 %v1450_v33  ;;  %v1460_v41 = vld [vmem:[#allocation2 + $0x3c] ss:$24 sps:$4 sm:$0xff]  }
  0x45   :  { %702 = vmatprep.mubr.bf16.mxu1 %v1453_v35  ;;  %v1458_v40 = vld [vmem:[#allocation2 + $0x34] ss:$24 sps:$4 sm:$0xff]   ;;  %v1462_v42 = vld [vmem:[#allocation2 + $0x30] ss:$24 sps:$4 sm:$0xff]   ;;  %v1466_v46 = vld [vmem:[#allocation5 + $0x160] sm:$0xff]  }
  0x46   :  { %1261 = vmatpush3.bf16.msra.mxu0 %v1430_v14  ;;  %v1463_v43 = vld [vmem:[#allocation2 + $0x38] ss:$24 sps:$4 sm:$0xff]   ;;  %v1464_v44 = vld [vmem:[#allocation5 + $0x168] sm:$0xff]   ;;  %v1467_v47 = vld [vmem:[#allocation5 + $0x120] sm:$0xff]  }
  0x47   :  { %1301 = vmatpush3.bf16.msra.mxu1 %v1431_v15  ;;  %1262 = vmatprep.subr.bf16.mxu0 %v1432_v16  ;;  %v1465_v45 = vld [vmem:[#allocation5 + $0x128] sm:$0xff]   ;;  %v1468_v48 = vld [vmem:[#allocation2 + $0x64] ss:$24 sps:$4 sm:$0xff]   ;;  %v1472_v50 = vld [vmem:[#allocation2 + $0x60] ss:$24 sps:$4 sm:$0xff]  }
  0x48   :  { %1302 = vmatprep.subr.bf16.mxu1 %v1433_v17  ;;  %v1470_v49 = vld [vmem:[#allocation2 + $0x6c] ss:$24 sps:$4 sm:$0xff]   ;;  %v1474_v51 = vld [vmem:[#allocation5 + $0x158] sm:$0xff]   ;;  %v1473_v52 = vld [vmem:[#allocation2 + $0x68] ss:$24 sps:$4 sm:$0xff]  }
  0x49   :  { %v1475_v53 = vld [vmem:[#allocation5 + $0x118] sm:$0xff]   ;;  %v1476_v54 = vld [vmem:[#allocation5 + $0x150] sm:$0xff]   ;;  %v1484_v58 = vld [vmem:[#allocation5 + $0x148] sm:$0xff]  }
  0x4a   :  { %1263 = vmatpush3.bf16.msra.mxu0 %v1434_v18  ;;  %v1478_v55 = vld [vmem:[#allocation2 + $0x94] ss:$24 sps:$4 sm:$0xff]   ;;  %v1482_v59 = vld [vmem:[#allocation2 + $0x90] ss:$24 sps:$4 sm:$0xff]   ;;  %v1486_v62 = vld [vmem:[#allocation5 + $0x140] sm:$0xff]  }
  0x4b   :  { %1303 = vmatpush3.bf16.msra.mxu1 %v1435_v19  ;;  %1264 = vmatprep.subr.bf16.mxu0 %v1436_v20  ;;  %v1480_v56 = vld [vmem:[#allocation2 + $0x9c] ss:$24 sps:$4 sm:$0xff]   ;;  %v1483_v60 = vld [vmem:[#allocation2 + $0x98] ss:$24 sps:$4 sm:$0xff]   ;;  %v1485_v61 = vld [vmem:[#allocation5 + $0x108] sm:$0xff]  }
  0x4c   :  { %1304 = vmatprep.subr.bf16.mxu1 %v1437_v21  ;;  %v1477_v57 = vld [vmem:[#allocation5 + $0x110] sm:$0xff]   ;;  %v1487_v0 = vld [vmem:[#allocation5 + $0x100] sm:$0xff]  }
  0x4d   :  { %v1490_v63 = vld [vmem:[#allocation2 + $0x14] ss:$24 sps:$4 sm:$0xff]   ;;  %v1488_v1 = vld [vmem:[#allocation2 + $0x10] ss:$24 sps:$4 sm:$0xff]   ;;  %v1491_v2 = vld [vmem:[#allocation2 + $0x44] ss:$24 sps:$4 sm:$0xff]  }
  0x4e   :  { %1265 = vmatpush3.bf16.msra.mxu0 %v1438_v22  ;;  %v1493_v3 = vld [vmem:[#allocation2 + $0x40] ss:$24 sps:$4 sm:$0xff]   ;;  %v1494_v4 = vld [vmem:[#allocation2 + $0x74] ss:$24 sps:$4 sm:$0xff]   ;;  %v1496_v5 = vld [vmem:[#allocation2 + $0x70] ss:$24 sps:$4 sm:$0xff]  }
  0x4f   :  { %1305 = vmatpush3.bf16.msra.mxu1 %v1439_v23  ;;  %1266 = vmatprep.subr.bf16.mxu0 %v1440_v24  ;;  %v1497_v6 = vld [vmem:[#allocation2 + $0xa4] ss:$24 sps:$4 sm:$0xff]   ;;  %v1499_v7 = vld [vmem:[#allocation2 + $0xa0] ss:$24 sps:$4 sm:$0xff]   ;;  %v1650_v24 = vmov 0  }
  0x50   :  { %1306 = vmatprep.subr.bf16.mxu1 %v1441_v25  ;;  %v1502_v8 = vld [vmem:[#allocation7 + $0x74] ss:$8 sps:$4 sm:$0xff]   ;;  %v1500_v9 = vld [vmem:[#allocation7 + $0x70] ss:$8 sps:$4 sm:$0xff]   ;;  %v1505_v10 = vld [vmem:[#allocation7 + $0x64] ss:$8 sps:$4 sm:$0xff]  }
  0x51   :  { %v1503_v11 = vld [vmem:[#allocation7 + $0x60] ss:$8 sps:$4 sm:$0xff]   ;;  %v1508_v12 = vld [vmem:[#allocation7 + $0x54] ss:$8 sps:$4 sm:$0xff]   ;;  %v1506_v13 = vld [vmem:[#allocation7 + $0x50] ss:$8 sps:$4 sm:$0xff]  }
  0x52   :  { %1267 = vmatpush3.bf16.msra.mxu0 %v1442_v26  ;;  %v1511_v14 = vld [vmem:[#allocation7 + $0x44] ss:$8 sps:$4 sm:$0xff]   ;;  %v1509_v15 = vld [vmem:[#allocation7 + $0x40] ss:$8 sps:$4 sm:$0xff]   ;;  %v1514_v16 = vld [vmem:[#allocation7 + $0x34] ss:$8 sps:$4 sm:$0xff]  }
  0x53   :  { %1307 = vmatpush3.bf16.msra.mxu1 %v1443_v27  ;;  %1268 = vmatprep.subr.bf16.mxu0 %v1444_v28  ;;  %v1512_v17 = vld [vmem:[#allocation7 + $0x30] ss:$8 sps:$4 sm:$0xff]   ;;  %v1517_v18 = vld [vmem:[#allocation7 + $0x24] ss:$8 sps:$4 sm:$0xff]   ;;  %v1515_v19 = vld [vmem:[#allocation7 + $0x20] ss:$8 sps:$4 sm:$0xff]  }
  0x54   :  { %1308 = vmatprep.subr.bf16.mxu1 %v1445_v29  ;;  %v1520_v20 = vld [vmem:[#allocation7 + $0x14] ss:$8 sps:$4 sm:$0xff]   ;;  %v1518_v21 = vld [vmem:[#allocation7 + $0x10] ss:$8 sps:$4 sm:$0xff]   ;;  %v1523_v22 = vld [vmem:[#allocation7 + $0x4] ss:$8 sps:$4 sm:$0xff]  }
  0x55   :  { %v1521_v23 = vld [vmem:[#allocation7] ss:$8 sps:$4 sm:$0xff]   ;;  %v1524_v25 = vld [vmem:[#allocation8 + $0x38] sm:$0xff]   ;;  %v1525_v26 = vld [vmem:[#allocation8 + $0x30] sm:$0xff]  }
  0x56   :  { %1269 = vmatpush3.bf16.msra.mxu0 %v1446_v30  ;;  %v1526_v27 = vld [vmem:[#allocation8 + $0x28] sm:$0xff]  }
  0x57   :  { %1309 = vmatpush3.bf16.msra.mxu1 %v1447_v31  ;;  %1334 = vmatprep.subr.bf16.mxu0 %v1454_v36 }
  0x58   :  { %926 = vmatprep.subr.bf16.mxu1 %v1502_v8 }
  0x59   :  { %638 = vmatmul.mubr.bf16.vlgmr.msra.gmra.mxu0 %v1448_v32 }
  0x5a   :  { %703 = vmatmul.mubr.bf16.vlgmr.msra.gmra.mxu1 %v1451_v34  ;;  %1335 = vmatpush3.bf16.msra.mxu0 %v1455_v37 }
  0x5b   :  { %1336 = vmatprep.subr.bf16.mxu0 %v1456_v38  ;;  %645 = vmatprep.mubr.bf16.mxu0 %v1458_v40 }
  0x5c   :  { %710 = vmatprep.mubr.bf16.mxu1 %v1460_v41  ;;  %927 = vmatpush1.bf16.msra.mxu1 %v1500_v9 }
  0x5d   :  { %928 = vmatprep.subr.bf16.mxu1 %v1505_v10 }
  0x5e   :  { %1337 = vmatpush3.bf16.msra.mxu0 %v1457_v39 }
  0x5f   :  { %1338 = vmatprep.subr.bf16.mxu0 %v1464_v44 }
  0x60   :  { %929 = vmatpush1.bf16.msra.mxu1 %v1503_v11 }
  0x61   :  { %646 = vmatmul.mubr.bf16.gmra.mxu0 %v1462_v42  ;;  %930 = vmatprep.subr.bf16.mxu1 %v1508_v12 }
  0x62   :  { %711 = vmatmul.mubr.bf16.gmra.mxu1 %v1463_v43  ;;  %1339 = vmatpush3.bf16.msra.mxu0 %v1465_v45 }
  0x63   :  { %1340 = vmatprep.subr.bf16.mxu0 %v1466_v46  ;;  %653 = vmatprep.mubr.bf16.mxu0 %v1468_v48 }
  0x64   :  { %718 = vmatprep.mubr.bf16.mxu1 %v1470_v49  ;;  %931 = vmatpush1.bf16.msra.mxu1 %v1506_v13 }
  0x65   :  { %932 = vmatprep.subr.bf16.mxu1 %v1511_v14 }
  0x66   :  { %1341 = vmatpush3.bf16.msra.mxu0 %v1467_v47 }
  0x67   :  { %1342 = vmatprep.subr.bf16.mxu0 %v1474_v51 }
  0x68   :  { %933 = vmatpush1.bf16.msra.mxu1 %v1509_v15 }
  0x69   :  { %654 = vmatmul.mubr.bf16.gmra.mxu0 %v1472_v50  ;;  %934 = vmatprep.subr.bf16.mxu1 %v1514_v16 }
  0x6a   :  { %719 = vmatmul.mubr.bf16.gmra.mxu1 %v1473_v52  ;;  %1343 = vmatpush3.bf16.msra.mxu0 %v1475_v53 }
  0x6b   :  { %661 = vmatprep.mubr.bf16.mxu0 %v1478_v55  ;;  %1344 = vmatprep.subr.bf16.mxu0 %v1476_v54 }
  0x6c   :  { %726 = vmatprep.mubr.bf16.mxu1 %v1480_v56  ;;  %935 = vmatpush1.bf16.msra.mxu1 %v1512_v17 }
  0x6d   :  { %936 = vmatprep.subr.bf16.mxu1 %v1517_v18 }
  0x6e   :  { %1345 = vmatpush3.bf16.msra.mxu0 %v1477_v57 }
  0x6f   :  { %1346 = vmatprep.subr.bf16.mxu0 %v1484_v58 }
  0x70   :  { %937 = vmatpush1.bf16.msra.mxu1 %v1515_v19 }
  0x71   :  { %662 = vmatmul.mubr.bf16.gmra.mxu0 %v1482_v59  ;;  %938 = vmatprep.subr.bf16.mxu1 %v1520_v20 }
  0x72   :  { %727 = vmatmul.mubr.bf16.gmra.mxu1 %v1483_v60  ;;  %767 = vmatprep.mubr.bf16.mxu0 %v1490_v63 }
  0x73   :  { %1347 = vmatpush3.bf16.msra.mxu0 %v1485_v61  ;;  %958 = vmatprep.mubr.bf16.mxu1 %v1650_v24 }
  0x74   :  { %1348 = vmatprep.subr.bf16.mxu0 %v1486_v62  ;;  %939 = vmatpush1.bf16.msra.mxu1 %v1518_v21 }
  0x75   :  { %940 = vmatprep.subr.bf16.mxu1 %v1523_v22 }
  0x77   :  { %1349 = vmatpush3.bf16.msra.mxu0 %v1487_v0  ;;  %v800_v0 = vlaneseq }
  0x78   :  { %941 = vmatpush1.bf16.msra.mxu1 %v1521_v23  ;;  %1384 = vmatprep.subr.bf16.mxu0 %v1524_v25  ;;  %v1227_v23 = vld [vmem:[%s1745_s4] ss:$0 sm:$0xff] }
  0x79   :  { %v1708_v8 = vand.u32 127, %v800_v0 }
  0x7a   :  { %768 = vmatmul.mubr.bf16.vlgmr.msra.gmra.mxu0 %v1488_v1 }
  0x7b   :  { %775 = vmatprep.mubr.bf16.mxu0 %v1491_v2  ;;  %1385 = vmatpush3.bf16.msra.mxu0 %v1524_v25  ;;  %vm802_vm0 = vcmp.lt.s32.totalorder %v1708_v8, 64  ;;  %v1529_v8 = vld [vmem:[#allocation8 + $0x10] sm:$0xff]  }
  0x7c   :  { %1386 = vmatprep.subr.bf16.mxu0 %v1525_v26 }
  0x7f   :  { %1387 = vmatpush3.bf16.msra.mxu0 %v1525_v26 }
  0x80   :  { %1388 = vmatprep.subr.bf16.mxu0 %v1526_v27 }
  0x82   :  { %776 = vmatmul.mubr.bf16.gmra.mxu0 %v1493_v3 }
  0x83   :  { %783 = vmatprep.mubr.bf16.mxu0 %v1494_v4  ;;  %1389 = vmatpush3.bf16.msra.mxu0 %v1526_v27 }
  0x8a   :  { %784 = vmatmul.mubr.bf16.gmra.mxu0 %v1496_v5 }
  0x8b   :  { %791 = vmatprep.mubr.bf16.mxu0 %v1497_v6 }
  0x92   :  { %792 = vmatmul.mubr.bf16.gmra.mxu0 %v1499_v7 }
 0x119   :  { %v1270_v28 = vpop.f32.mrf.mxu0 }
 0x11a   :  { %v1310_v29 = vpop.f32.mrf.mxu1 }
 0x11b   :  { %v1271_v30 = vpop.f32.mrf.mxu0 }
 0x11c   :  { %v1311_v31 = vpop.f32.mrf.mxu1  ;;  %v1272_v1 = vadd.f32 %v1271_v30, %v1270_v28 }
 0x11d   :  { %v1273_v32 = vpop.f32.mrf.mxu0  ;;  %v1312_v2 = vadd.f32 %v1311_v31, %v1310_v29 }
 0x11e   :  { %v1313_v33 = vpop.f32.mrf.mxu1 }
 0x11f   :  { %v1274_v34 = vpop.f32.mrf.mxu0  ;;  %v705_v10 = vadd.f32 %v1312_v2, %v1272_v1 }
 0x120   :  { %v1314_v36 = vpop.f32.mrf.mxu1  ;;  %v1275_v11 = vadd.f32 %v1274_v34, %v1273_v32 }
 0x121   :  { %v1276_v35 = vpop.f32.mrf.mxu0  ;;  %v1315_v12 = vadd.f32 %v1314_v36, %v1313_v33 }
 0x122   :  { %v1316_v39 = vpop.f32.mrf.mxu1 }
 0x123   :  { %v1277_v37 = vpop.f32.mrf.mxu0  ;;  %v708_v30 = vadd.f32 %v1315_v12, %v1275_v11  ;;  %v1527_v11 = vld [vmem:[#allocation8 + $0x20] sm:$0xff]   ;;  %v1528_v12 = vld [vmem:[#allocation8 + $0x18] sm:$0xff]  }
 0x124   :  { %v1317_v42 = vpop.f32.mrf.mxu1  ;;  %v1278_v25 = vadd.f32 %v1277_v37, %v1276_v35  ;;  %1390 = vmatprep.subr.bf16.mxu0 %v1527_v11 }
 0x125   :  { %v1704_v38 = vpop.f32.mrf.mxu0  ;;  %v1318_v26 = vadd.f32 %v1317_v42, %v1316_v39  ;;  %1391 = vmatpush3.bf16.msra.mxu0 %v1527_v11 }
 0x126   :  { %v1319_v45 = vpop.f32.mrf.mxu1  ;;  %1392 = vmatprep.subr.bf16.mxu0 %v1528_v12 }
 0x127   :  { %v1706_v40 = vpop.f32.mrf.mxu0 }
 0x128   :  { %v1320_v48 = vpop.f32.mrf.mxu1  ;;  %v1281_v35 = vadd.f32 %v1706_v40, %v1704_v38 }
 0x129   :  { %v1282_v41 = vpop.f32.mrf.mxu0  ;;  %v1321_v37 = vadd.f32 %v1320_v48, %v1319_v45  ;;  %1393 = vmatpush3.bf16.msra.mxu0 %v1528_v12 }
 0x12a   :  { %v1322_v51 = vpop.f32.mrf.mxu1  ;;  %1394 = vmatprep.subr.bf16.mxu0 %v1529_v8 }
 0x12b   :  { %v1283_v43 = vpop.f32.mrf.mxu0  ;;  %v716_v38 = vadd.f32 %v1321_v37, %v1281_v35 }
 0x12c   :  { %v1323_v53 = vpop.f32.mrf.mxu1  ;;  %v1284_v4 = vadd.f32 %v1283_v43, %v1282_v41 }
 0x12d   :  { %v1285_v44 = vpop.f32.mrf.mxu0  ;;  %v1324_v5 = vadd.f32 %v1323_v53, %v1322_v51  ;;  %v713_v51 = vadd.f32 %v1318_v26, %v1278_v25  ;;  %1395 = vmatpush3.bf16.msra.mxu0 %v1529_v8 }
 0x12e   :  { %v1325_v56 = vpop.f32.mrf.mxu1 }
 0x12f   :  { %v1286_v46 = vpop.f32.mrf.mxu0  ;;  %v721_v14 = vadd.f32 %v1324_v5, %v1284_v4 }
 0x130   :  { %v1326_v59 = vpop.f32.mrf.mxu1  ;;  %v1287_v15 = vadd.f32 %v1286_v46, %v1285_v44 }
 0x131   :  { %v1288_v47 = vpop.f32.mrf.mxu0  ;;  %v1327_v16 = vadd.f32 %v1326_v59, %v1325_v56 }
 0x132   :  { %v1328_v62 = vpop.f32.mrf.mxu1 }
 0x133   :  { %v1289_v49 = vpop.f32.mrf.mxu0  ;;  %v724_v31 = vadd.f32 %v1327_v16, %v1287_v15  ;;  %v1244_v16 = vld [vmem:[%s1745_s4 + $0x1] ss:$0 sm:$0xff] }
 0x134   :  { %v1329_v6 = vpop.f32.mrf.mxu1  ;;  %v1290_v27 = vadd.f32 %v1289_v49, %v1288_v47 }
 0x135   :  { %v1291_v50 = vpop.f32.mrf.mxu0  ;;  %v1330_v28 = vadd.f32 %v1329_v6, %v1328_v62 }
 0x136   :  { %v1331_v18 = vpop.f32.mrf.mxu1 }
 0x137   :  { %v1292_v52 = vpop.f32.mrf.mxu0  ;;  %v729_v39 = vadd.f32 %v1330_v28, %v1290_v27 }
 0x138   :  { %v1332_v34 = vpop.f32.mrf.mxu1  ;;  %v1293_v47 = vadd.f32 %v1292_v52, %v1291_v50 }
 0x139   :  { %v1333_v49 = vadd.f32 %v1332_v34, %v1331_v18  ;;  %v1245_v34 = vld [vmem:[%s1745_s4 + $0x2] ss:$0 sm:$0xff]  ;;  %s1651_s4 = smov [#allocation10]  }
 0x13a   :  { %v1350_v54 = vpop.f32.mrf.mxu0  ;;  %s1141_s21 = sshll.u32 %s1651_s4, 4  ;;  %s1142_s21 = int_to_ptr.vmem [resolvable:$true] %s1141_s21 }
 0x13b   :  { %v732_v40 = vadd.f32 %v1333_v49, %v1293_v47  ;;  %s1612_s22 = scalar_lea.vmem %s1142_s21, 512  ;;  %p1617_p7 = scmp.lt.s32.totalorder %s1142_s21, %s1142_s21 }
 0x13c   :  { %v1351_v55 = vpop.f32.mrf.mxu0  ;;  %p1613_p6 = scmp.ne.s32.totalorder %s1142_s21, %s1612_s22  ;;  %p1618_p8 = scmp.lt.s32.totalorder %s1612_s22, %s1612_s22 }
 0x13d   :  { %v1352_v9 = vadd.f32 %v1351_v55, %v1350_v54 }
 0x13e   :  { %v1353_v57 = vpop.f32.mrf.mxu0  ;;  %p1619_p9 = por %p1618_p8, %p1617_p7 }
 0x13f   :  { %v770_v20 = vadd.f32 %v1352_v9, %v705_v10 }
 0x140   :  { %v1354_v58 = vpop.f32.mrf.mxu0  ;;  %p1620_p10 = pnand %p1619_p9, %p1613_p6 }
 0x141   :  { %v1355_v21 = vadd.f32 %v1354_v58, %v1353_v57 }
 0x142   :  { %v1356_v60 = vpop.f32.mrf.mxu0 }
 0x143   :  { %v773_v43 = vadd.f32 %v1355_v21, %v708_v30 }
 0x144   :  { %v1357_v61 = vpop.f32.mrf.mxu0 }
 0x145   :  { %v1358_v44 = vadd.f32 %v1357_v61, %v1356_v60 }
 0x146   :  { %v1359_v63 = vpop.f32.mrf.mxu0 }
 0x147   :  { %v778_v58 = vadd.f32 %v1358_v44, %v713_v51 }
 0x148   :  { %v1360_v3 = vpop.f32.mrf.mxu0 }
 0x149   :  { %v1361_v59 = vadd.f32 %v1360_v3, %v1359_v63 }
 0x14a   :  { %v1362_v7 = vpop.f32.mrf.mxu0 }
 0x14b   :  { %v781_v1 = vadd.f32 %v1361_v59, %v716_v38 }
 0x14c   :  { %v1363_v13 = vpop.f32.mrf.mxu0 }
 0x14d   :  { %v1364_v17 = vadd.f32 %v1363_v13, %v1362_v7  ;;  %v1530_v13 = vld [vmem:[#allocation8 + $0x8] sm:$0xff]  }
 0x14e   :  { %v1365_v19 = vpop.f32.mrf.mxu0  ;;  %1396 = vmatprep.subr.bf16.mxu0 %v1530_v13 }
 0x14f   :  { %v786_v22 = vadd.f32 %v1364_v17, %v721_v14  ;;  %1397 = vmatpush3.bf16.msra.mxu0 %v1530_v13 }
 0x150   :  { %v1366_v29 = vpop.f32.mrf.mxu0 }
 0x151   :  { %v803_v32 = vsel %vm802_vm0, %v770_v20, %v786_v22  ;;  %v1367_v33 = vadd.f32 %v1366_v29, %v1365_v19 }
 0x152   :  { %v812_v36 = vadd.f32 %v1227_v23, %v803_v32  ;;  %v1368_v41 = vpop.f32.mrf.mxu0 }
 0x153   :  { %v789_v46 = vadd.f32 %v1367_v33, %v724_v31 }
 0x154   :  { %v1369_v42 = vpop.f32.mrf.mxu0  ;;  %v820_v55 = vmul.f32 0.01, %v812_v36  ;;  %vm816_vm1 = vcmp.gt.f32.partialorder %v812_v36, 0.0 }
 0x155   :  { %v804_v53 = vsel %vm802_vm0, %v773_v43, %v789_v46  ;;  %v1370_v54 = vadd.f32 %v1369_v42, %v1368_v41 }
 0x156   :  { %v813_v56 = vadd.f32 %v1227_v23, %v804_v53  ;;  %v1371_v57 = vpop.f32.mrf.mxu0  ;;  %v824_v50 = vsel %vm816_vm1, %v812_v36, %v820_v55 }
 0x157   :  { %v794_v60 = vadd.f32 %v1370_v54, %v729_v39 }
 0x158   :  { %vm817_vm2 = vcmp.gt.f32.partialorder %v813_v56, 0.0  ;;  %v821_v61 = vmul.f32 0.01, %v813_v56  ;;  %v1372_v62 = vpop.f32.mrf.mxu0 }
 0x159   :  { %v805_v45 = vsel %vm802_vm0, %v778_v58, %v794_v60  ;;  %v1373_v48 = vadd.f32 %v1372_v62, %v1371_v57 }
 0x15a   :  { %v1722_v52 = vsel %vm817_vm2, %v813_v56, %v821_v61  ;;  %v814_v0 = vadd.f32 %v1227_v23, %v805_v45 }
 0x15b   :  { %v797_v2 = vadd.f32 %v1373_v48, %v732_v40  ;;  %v828_v4 = vpack.c.bf16 %v1722_v52, %v824_v50 }
 0x15c   :  { %v822_v5 = vmul.f32 0.01, %v814_v0  ;;  %vm818_vm3 = vcmp.gt.f32.partialorder %v814_v0, 0.0 }
 0x15d   :  { %v806_v63 = vsel %vm802_vm0, %v781_v1, %v797_v2  ;;  %959 = vmatmul.mubr.bf16.vlgmr.msra.gmra.mxu1 %v828_v4 }
 0x15e   :  { %v815_v3 = vadd.f32 %v1227_v23, %v806_v63  ;;  %968 = vmatprep.mubr.bf16.mxu1 %v1650_v24  ;;  %v826_v7 = vsel %vm818_vm3, %v814_v0, %v822_v5  ;;  %v1531_v24 = vld [vmem:[#allocation8] sm:$0xff]  }
 0x15f   :  { %1398 = vmatprep.subr.bf16.mxu0 %v1531_v24 }
 0x160   :  { %vm819_vm4 = vcmp.gt.f32.partialorder %v815_v3, 0.0  ;;  %v823_v6 = vmul.f32 0.01, %v815_v3  ;;  %1399 = vmatpush3.bf16.msra.mxu0 %v1531_v24 }
 0x162   :  { %v827_v9 = vsel %vm819_vm4, %v815_v3, %v823_v6 }
 0x163   :  { %v829_v10 = vpack.c.bf16 %v827_v9, %v826_v7 }
 0x165   :  { %969 = vmatmul.mubr.bf16.gmra.mxu1 %v829_v10 }
 0x21d   :  { %v960_v14 = vpop.f32.mrf.mxu1 }
 0x21e   :  { %v979_v46 = vadd.f32 %v960_v14, %v824_v50 }
 0x21f   :  { %v962_v15 = vpop.f32.mrf.mxu1 }
 0x220   :  { %v988_v18 = vadd.f32 %v1244_v16, %v962_v15 }
 0x221   :  { %v964_v17 = vpop.f32.mrf.mxu1 }
 0x222   :  { %v992_v22 = vmax.f32 %v988_v18, 0.0  ;;  %v980_v57 = vadd.f32 %v964_v17, %v1722_v52 }
 0x223   :  { %v966_v19 = vpop.f32.mrf.mxu1 }
 0x224   :  { %v989_v20 = vadd.f32 %v1244_v16, %v966_v19 }
 0x225   :  { %v970_v21 = vpop.f32.mrf.mxu1 }
 0x226   :  { %v993_v23 = vmax.f32 %v989_v20, 0.0  ;;  %v981_v41 = vadd.f32 %v970_v21, %v826_v7 }
 0x227   :  { %v972_v25 = vpop.f32.mrf.mxu1 }
 0x228   :  { %v996_v26 = vpack.c.bf16 %v993_v23, %v992_v22  ;;  %v990_v28 = vadd.f32 %v1244_v16, %v972_v25 }
 0x229   :  { %v974_v27 = vpop.f32.mrf.mxu1 }
 0x22a   :  { %1400 = vmatprep.mubr.bf16.mxu0 %v996_v26  ;;  %v994_v31 = vmax.f32 %v990_v28, 0.0  ;;  %v982_v37 = vadd.f32 %v974_v27, %v827_v9 }
 0x22b   :  { %v976_v29 = vpop.f32.mrf.mxu1 }
 0x22c   :  { %v991_v30 = vadd.f32 %v1244_v16, %v976_v29 }
 0x22e   :  { %v995_v32 = vmax.f32 %v991_v30, 0.0 }
 0x230   :  { %v997_v33 = vpack.c.bf16 %v995_v32, %v994_v31 }
 0x232   :  { %1401 = vmatmul.mubr.bf16.vlgmr.msra.gmra.mxu0 %v997_v33 }
 0x2f2   :  { %v1402_v36 = vpop.f32.mrf.mxu0 }
 0x2f3   :  { %v1110_v43 = vadd.f32 %v1402_v36, %v1245_v34 }
 0x2f4   :  { %v1101_v44 = vpop.f32.mrf.mxu0 }
 0x2f5   :  { %v1118_v51 = vadd.f32 %v1110_v43, %v981_v41  ;;  %v1102_v35 = vadd.f32 %v1245_v34, %v1101_v44 }
 0x2f6   :  { %v1403_v39 = vpop.f32.mrf.mxu0 }
 0x2f7   :  { %vm1122_vm5 = vcmp.gt.f32.partialorder %v1118_v51, 0.0  ;;  %v1126_v42 = vmul.f32 0.01, %v1118_v51  ;;  %v1116_v47 = vadd.f32 %v1102_v35, %v979_v46  ;;  %v1113_v49 = vadd.f32 %v1403_v39, %v1245_v34 }
 0x2f8   :  { %v1104_v53 = vpop.f32.mrf.mxu0 }
 0x2f9   :  { %v1130_v54 = vsel %vm1122_vm5, %v1118_v51, %v1126_v42  ;;  %vm1120_vm6 = vcmp.gt.f32.partialorder %v1116_v47, 0.0  ;;  %v1124_v55 = vmul.f32 0.01, %v1116_v47  ;;  %v1119_v56 = vadd.f32 %v1113_v49, %v982_v37 }
 0x2fa   :  { %1134 = vst [vmem:[#allocation10 + $0x10] sm:$0xff] %v1130_v54  ;;  %v1105_v58 = vadd.f32 %v1245_v34, %v1104_v53 }
 0x2fb   :  { %v1128_v59 = vsel %vm1120_vm6, %v1116_v47, %v1124_v55  ;;  %vm1123_vm7 = vcmp.gt.f32.partialorder %v1119_v56, 0.0  ;;  %v1127_v60 = vmul.f32 0.01, %v1119_v56 }
 0x2fc   :  { %1132 = vst [vmem:[#allocation10] sm:$0xff] %v1128_v59  ;;  %v1117_v61 = vadd.f32 %v1105_v58, %v980_v57 }
 0x2fd   :  { %v1131_v62 = vsel %vm1123_vm7, %v1119_v56, %v1127_v60 }
 0x2fe   :  { %1135 = vst [vmem:[#allocation10 + $0x18] sm:$0xff] %v1131_v62  ;;  %vm1121_vm8 = vcmp.gt.f32.partialorder %v1117_v61, 0.0  ;;  %v1125_v38 = vmul.f32 0.01, %v1117_v61 }
 0x300   :  { %v1129_v40 = vsel %vm1121_vm8, %v1117_v61, %v1125_v38 }
 0x301   :  { %1133 = vst [vmem:[#allocation10 + $0x8] sm:$0xff] %v1129_v40 }
 0x302   :  { %1623 = shalt.err (!%p1620_p10)
}
 0x303   :  { %1147 = dma.vmem_to_hbm [thread:$0]  %s1142_s21, 512, %s1746_s5, [#allocation4], %s1647_s9, %s1647_s9, %s1648_s10  }
 0x304   :  { %1638 = dma.done.wait [#allocation4], 512  }
 0x305   :  { %1639 = vsyncadd [#allocation4], 4294966784 }
 0x306   :  { %1151 = vsyncpa [#allocation3], 1 }
 0x307   :  { %1152 = vsyncpa [#allocation6], 1 }
 0x308   :  { %1153 = vsyncpa [#allocation9], 1 }
 0x309   :  { %1154 = vsyncpa [#allocation4], 1 }

</bundles_post_ra>
